<compile_context>
chip_gen: v7x
topology: tpu7x:2x2x1
jax: 0.10.0
libtpu: 0.0.40
codegen_flags: <defaults>
</compile_context>

<pallas_src>
import functools

import numpy as np
import jax
import jax.numpy as jnp
from jax import lax
from jax.experimental import pallas as pl
from jax.experimental.pallas import tpu as pltpu


def _round_up(x, m):
    return ((x + m - 1) // m) * m


def _conv_bn_elu_kernel(x_ref, w_ref, shift_ref, o_ref, slab_ref, *, k, wp, cin, tm):
    # x_ref:     (1, Cin, Tm+halo)  bf16 — tile of the channel-major stream (+halo)
    # w_ref:     (Cout, Cin*k*k)    bf16 — BN-scale-folded conv weights (resident)
    # shift_ref: (Cout, 1)          f32  — folded conv-bias + BN shift
    # o_ref:     (Cout, Tm)         bf16 — lane-dense output tile
    # slab_ref:  (Cin*k*k, Tm)      bf16 — assembled shifted slabs (VMEM scratch)
    #
    # Assemble every kernel offset exactly once (each unaligned lane shift is a
    # single rotate/copy), then one fused K = Cin*k*k matmul on the MXU.
    for i in range(k):
        for j in range(k):
            r = i * k + j
            d = i * wp + j                                   # static lane shift
            slab_ref[r * cin:(r + 1) * cin, :] = x_ref[0, :, d:d + tm]
    y = jnp.dot(w_ref[...], slab_ref[...],
                preferred_element_type=jnp.float32)          # (Cout, Tm) f32
    y = y + shift_ref[...]                                   # per-channel shift
    # ELU(alpha=1) in f32.  exp is evaluated everywhere but jnp.where selects,
    # so no NaN propagates; exp lands on the EUP slot (off the VALU critical path).
    o_ref[...] = jnp.where(y > 0, y, jnp.exp(y) - 1.0).astype(o_ref.dtype)


def iconv_forward(x, weight, bias, gamma, beta, running_mean, running_var,
                  *, kernel_size, stride, eps=1e-5, tm_max=32768):
    N, Cin, H, W = x.shape
    Cout = weight.shape[0]
    k = int(kernel_size)
    s = int(stride)
    p = int(np.floor((k - 1) / 2))

    Hp, Wp = H + 2 * p, W + 2 * p
    Ho = (Hp - k) // s + 1
    Wo = (Wp - k) // s + 1
    Ho1, Wo1 = Hp - k + 1, Wp - k + 1                  # stride-1 valid extents

    # --- fold BN (running stats) + conv bias into weights / shift -----------
    inv_std = 1.0 / jnp.sqrt(running_var.astype(jnp.float32) + eps)
    ch_scale = gamma.astype(jnp.float32) * inv_std                       # (Cout,)
    w_scaled = weight.astype(jnp.float32) * ch_scale[:, None, None, None]
    shift = (beta.astype(jnp.float32)
             + (bias.astype(jnp.float32) - running_mean.astype(jnp.float32)) * ch_scale)
    # (Cout, k*k*Cin); column (i*k + j)*Cin + c  == w_scaled[:, c, i, j]
    w2 = w_scaled.transpose(0, 2, 3, 1).reshape(Cout, k * k * Cin).astype(jnp.bfloat16)
    shift = shift.reshape(Cout, 1)

    # --- channel-major stream: all samples concatenated along the lane axis --
    xp = jnp.pad(x, ((0, 0), (0, 0), (p, p), (p, p)))
    stream = xp.transpose(1, 0, 2, 3).reshape(Cin, N * Hp * Wp).astype(jnp.bfloat16)
    wtot = N * Hp * Wp                                  # valid virtual columns
    d_max = (k - 1) * Wp + (k - 1)                      # largest lane shift
    halo = _round_up(max(d_max, 1), 128)                # keep tiles lane-aligned
    tm = min(int(tm_max), _round_up(wtot, 128))         # spatial tile (lane dim)
    num_tiles = (wtot + tm - 1) // tm
    stream = jnp.pad(stream, ((0, 0), (0, num_tiles * tm + halo - wtot)))
    # Pre-tiled input with the halo duplicated at tile boundaries (no im2col:
    # only `halo` of `tm` columns are duplicated, and only when num_tiles > 1).
    x_tiles = jnp.stack(
        [stream[:, t * tm:t * tm + tm + halo] for t in range(num_tiles)], axis=0)

    # --- explicit VMEM budget for the chosen tile (with headroom) ------------
    in_b = Cin * (tm + halo) * 2
    out_b = Cout * tm * 2
    slab_b = Cin * k * k * tm * 2
    vmem_budget = int(2 * in_b + 2 * out_b + 2 * slab_b
                      + 6 * Cout * tm * 4 + (4 << 20))

    kernel = functools.partial(_conv_bn_elu_kernel, k=k, wp=Wp, cin=Cin, tm=tm)
    ov = pl.pallas_call(
        kernel,
        out_shape=jax.ShapeDtypeStruct((Cout, num_tiles * tm), jnp.bfloat16),
        grid_spec=pltpu.PrefetchScalarGridSpec(
            num_scalar_prefetch=0,
            grid=(num_tiles,),
            in_specs=[
                pl.BlockSpec((1, Cin, tm + halo), lambda t: (t, 0, 0)),   # stream tile
                pl.BlockSpec((Cout, k * k * Cin), lambda t: (0, 0)),      # weights
                pl.BlockSpec((Cout, 1), lambda t: (0, 0)),                # folded shift
            ],
            out_specs=pl.BlockSpec((Cout, tm), lambda t: (0, t)),
            scratch_shapes=[pltpu.VMEM((Cin * k * k, tm), jnp.bfloat16)],
        ),
        compiler_params=pltpu.CompilerParams(
            dimension_semantics=("parallel",),
            vmem_limit_bytes=vmem_budget),
    )(x_tiles, w2, shift)

    # Drop tile padding, split samples, discard wrap/pad columns; channel-major
    # already, so only a cheap (Cout, N) leading-dim swap remains.
    ov = ov[:, :wtot].reshape(Cout, N, Hp, Wp).transpose(1, 0, 2, 3)
    out = ov[:, :, :Ho1, :Wo1]
    # TODO(synk): stride > 1 path — subsample in-kernel before the store instead.
    out = out[:, :, ::s, ::s][:, :, :Ho, :Wo]
    return out.astype(jnp.float32)


def _reference(x, weight, bias, gamma, beta, running_mean, running_var,
               *, kernel_size, stride, eps=1e-5):
    p = int(np.floor((kernel_size - 1) / 2))
    xp = jnp.pad(x, ((0, 0), (0, 0), (p, p), (p, p)))
    y = lax.conv_general_dilated(
        xp, weight, window_strides=(stride, stride), padding="VALID",
        dimension_numbers=("NCHW", "OIHW", "NCHW"))
    y = y + bias[None, :, None, None]
    inv_std = 1.0 / jnp.sqrt(running_var + eps)
    y = (y - running_mean[None, :, None, None]) * (gamma * inv_std)[None, :, None, None] \
        + beta[None, :, None, None]
    return jax.nn.elu(y)


if __name__ == "__main__":
    # iconv(num_in_channels=4, num_out_channels=8, kernel_size=3, stride=1)
    num_in, num_out, ksize, stride = 4, 8, 3, 1
    N, H, W = 2, 16, 16

    key = jax.random.PRNGKey(0)
    kx, kw, kb = jax.random.split(key, 3)
    x = jax.random.normal(kx, (N, num_in, H, W), dtype=jnp.float32)

    # Conv2d parameters (deterministic synthetic init, PyTorch shapes).
    weight = 0.1 * jax.random.normal(kw, (num_out, num_in, ksize, ksize), dtype=jnp.float32)
    bias = 0.05 * jax.random.normal(kb, (num_out,), dtype=jnp.float32)

    # BatchNorm2d parameters / running stats (deterministic, non-trivial).
    gamma = 1.0 + 0.1 * jnp.arange(num_out, dtype=jnp.float32)
    beta = 0.02 * jnp.arange(num_out, dtype=jnp.float32)
    running_mean = 0.05 * jnp.arange(num_out, dtype=jnp.float32)
    running_var = 1.0 + 0.1 * jnp.arange(num_out, dtype=jnp.float32)

    out = iconv_forward(x, weight, bias, gamma, beta, running_mean, running_var,
                        kernel_size=ksize, stride=stride)
    out = jax.block_until_ready(out)

    ref = _reference(x, weight, bias, gamma, beta, running_mean, running_var,
                     kernel_size=ksize, stride=stride)
    ref = jax.block_until_ready(ref)

    assert out.shape == (N, num_out, H, W), out.shape
    # Streamed operands AND the stored output are bf16 (accumulation and the
    # BN/ELU epilogue remain f32), so compare with a bf16-level tolerance.
    np.testing.assert_allclose(np.asarray(out), np.asarray(ref), rtol=5e-2, atol=5e-2)
    print("KERNEL_OK")
</pallas_src>

<mosaic_0001>
module attributes {stable_mosaic.version = 11 : i64} {
  func.func @_conv_bn_elu_kernel(%arg0: i32, %arg1: memref<1x4x896xbf16, #tpu.memory_space<vmem>>, %arg2: memref<8x36xbf16, #tpu.memory_space<vmem>>, %arg3: memref<8x1xf32, #tpu.memory_space<vmem>>, %arg4: memref<8x768xbf16, #tpu.memory_space<vmem>>, %arg5: memref<36x768xbf16, #tpu.memory_space<vmem>>) attributes {dimension_semantics = [#tpu.dimension_semantics<parallel>], iteration_bounds = array<i64: 1>, scalar_prefetch = 0 : i64, scratch_operands = 1 : i64, tpu.core_type = #tpu.core_type<tc>, window_params = [{transform_indices = @transform_0, window_bounds = array<i64: 1, 4, 896>}, {pipeline_mode = #tpu.pipeline_mode<synchronous>, transform_indices = @transform_1, window_bounds = array<i64: 8, 36>}, {pipeline_mode = #tpu.pipeline_mode<synchronous>, transform_indices = @transform_2, window_bounds = array<i64: 8, 1>}, {transform_indices = @transform_3, window_bounds = array<i64: 8, 768>}]} {
    %c0 = arith.constant 0 : index
    %c0_0 = arith.constant 0 : index
    %c0_1 = arith.constant 0 : index
    %0 = vector.load %arg1[%c0, %c0_0, %c0_1] : memref<1x4x896xbf16, #tpu.memory_space<vmem>>, vector<1x4x768xbf16>
    %1 = vector.shape_cast %0 : vector<1x4x768xbf16> to vector<4x768xbf16>
    %c0_2 = arith.constant 0 : index
    %c0_3 = arith.constant 0 : index
    %2 = vector.load %arg5[%c0_2, %c0_3] : memref<36x768xbf16, #tpu.memory_space<vmem>>, vector<4x768xbf16>
    tpu.vector_store %arg5[%c0_2, %c0_3], %1 {strides = array<i32>} : memref<36x768xbf16, #tpu.memory_space<vmem>>, vector<4x768xbf16>,
    %c0_4 = arith.constant 0 : index
    %c0_5 = arith.constant 0 : index
    %c1 = arith.constant 1 : index
    %3 = vector.load %arg1[%c0_4, %c0_5, %c1] : memref<1x4x896xbf16, #tpu.memory_space<vmem>>, vector<1x4x768xbf16>
    %4 = vector.shape_cast %3 : vector<1x4x768xbf16> to vector<4x768xbf16>
    %c4 = arith.constant 4 : index
    %c0_6 = arith.constant 0 : index
    %5 = vector.load %arg5[%c4, %c0_6] : memref<36x768xbf16, #tpu.memory_space<vmem>>, vector<4x768xbf16>
    tpu.vector_store %arg5[%c4, %c0_6], %4 {strides = array<i32>} : memref<36x768xbf16, #tpu.memory_space<vmem>>, vector<4x768xbf16>,
    %c0_7 = arith.constant 0 : index
    %c0_8 = arith.constant 0 : index
    %c2 = arith.constant 2 : index
    %6 = vector.load %arg1[%c0_7, %c0_8, %c2] : memref<1x4x896xbf16, #tpu.memory_space<vmem>>, vector<1x4x768xbf16>
    %7 = vector.shape_cast %6 : vector<1x4x768xbf16> to vector<4x768xbf16>
    %c8 = arith.constant 8 : index
    %c0_9 = arith.constant 0 : index
    %8 = vector.load %arg5[%c8, %c0_9] : memref<36x768xbf16, #tpu.memory_space<vmem>>, vector<4x768xbf16>
    tpu.vector_store %arg5[%c8, %c0_9], %7 {strides = array<i32>} : memref<36x768xbf16, #tpu.memory_space<vmem>>, vector<4x768xbf16>,
    %c0_10 = arith.constant 0 : index
    %c0_11 = arith.constant 0 : index
    %c18 = arith.constant 18 : index
    %9 = vector.load %arg1[%c0_10, %c0_11, %c18] : memref<1x4x896xbf16, #tpu.memory_space<vmem>>, vector<1x4x768xbf16>
    %10 = vector.shape_cast %9 : vector<1x4x768xbf16> to vector<4x768xbf16>
    %c12 = arith.constant 12 : index
    %c0_12 = arith.constant 0 : index
    %11 = vector.load %arg5[%c12, %c0_12] : memref<36x768xbf16, #tpu.memory_space<vmem>>, vector<4x768xbf16>
    tpu.vector_store %arg5[%c12, %c0_12], %10 {strides = array<i32>} : memref<36x768xbf16, #tpu.memory_space<vmem>>, vector<4x768xbf16>,
    %c0_13 = arith.constant 0 : index
    %c0_14 = arith.constant 0 : index
    %c19 = arith.constant 19 : index
    %12 = vector.load %arg1[%c0_13, %c0_14, %c19] : memref<1x4x896xbf16, #tpu.memory_space<vmem>>, vector<1x4x768xbf16>
    %13 = vector.shape_cast %12 : vector<1x4x768xbf16> to vector<4x768xbf16>
    %c16 = arith.constant 16 : index
    %c0_15 = arith.constant 0 : index
    %14 = vector.load %arg5[%c16, %c0_15] : memref<36x768xbf16, #tpu.memory_space<vmem>>, vector<4x768xbf16>
    tpu.vector_store %arg5[%c16, %c0_15], %13 {strides = array<i32>} : memref<36x768xbf16, #tpu.memory_space<vmem>>, vector<4x768xbf16>,
    %c0_16 = arith.constant 0 : index
    %c0_17 = arith.constant 0 : index
    %c20 = arith.constant 20 : index
    %15 = vector.load %arg1[%c0_16, %c0_17, %c20] : memref<1x4x896xbf16, #tpu.memory_space<vmem>>, vector<1x4x768xbf16>
    %16 = vector.shape_cast %15 : vector<1x4x768xbf16> to vector<4x768xbf16>
    %c20_18 = arith.constant 20 : index
    %c0_19 = arith.constant 0 : index
    %17 = vector.load %arg5[%c20_18, %c0_19] : memref<36x768xbf16, #tpu.memory_space<vmem>>, vector<4x768xbf16>
    tpu.vector_store %arg5[%c20_18, %c0_19], %16 {strides = array<i32>} : memref<36x768xbf16, #tpu.memory_space<vmem>>, vector<4x768xbf16>,
    %c0_20 = arith.constant 0 : index
    %c0_21 = arith.constant 0 : index
    %c36 = arith.constant 36 : index
    %18 = vector.load %arg1[%c0_20, %c0_21, %c36] : memref<1x4x896xbf16, #tpu.memory_space<vmem>>, vector<1x4x768xbf16>
    %19 = vector.shape_cast %18 : vector<1x4x768xbf16> to vector<4x768xbf16>
    %c24 = arith.constant 24 : index
    %c0_22 = arith.constant 0 : index
    %20 = vector.load %arg5[%c24, %c0_22] : memref<36x768xbf16, #tpu.memory_space<vmem>>, vector<4x768xbf16>
    tpu.vector_store %arg5[%c24, %c0_22], %19 {strides = array<i32>} : memref<36x768xbf16, #tpu.memory_space<vmem>>, vector<4x768xbf16>,
    %c0_23 = arith.constant 0 : index
    %c0_24 = arith.constant 0 : index
    %c37 = arith.constant 37 : index
    %21 = vector.load %arg1[%c0_23, %c0_24, %c37] : memref<1x4x896xbf16, #tpu.memory_space<vmem>>, vector<1x4x768xbf16>
    %22 = vector.shape_cast %21 : vector<1x4x768xbf16> to vector<4x768xbf16>
    %c28 = arith.constant 28 : index
    %c0_25 = arith.constant 0 : index
    %23 = vector.load %arg5[%c28, %c0_25] : memref<36x768xbf16, #tpu.memory_space<vmem>>, vector<4x768xbf16>
    tpu.vector_store %arg5[%c28, %c0_25], %22 {strides = array<i32>} : memref<36x768xbf16, #tpu.memory_space<vmem>>, vector<4x768xbf16>,
    %c0_26 = arith.constant 0 : index
    %c0_27 = arith.constant 0 : index
    %c38 = arith.constant 38 : index
    %24 = vector.load %arg1[%c0_26, %c0_27, %c38] : memref<1x4x896xbf16, #tpu.memory_space<vmem>>, vector<1x4x768xbf16>
    %25 = vector.shape_cast %24 : vector<1x4x768xbf16> to vector<4x768xbf16>
    %c32 = arith.constant 32 : index
    %c0_28 = arith.constant 0 : index
    %26 = vector.load %arg5[%c32, %c0_28] : memref<36x768xbf16, #tpu.memory_space<vmem>>, vector<4x768xbf16>
    tpu.vector_store %arg5[%c32, %c0_28], %25 {strides = array<i32>} : memref<36x768xbf16, #tpu.memory_space<vmem>>, vector<4x768xbf16>,
    %c0_29 = arith.constant 0 : index
    %c0_30 = arith.constant 0 : index
    %27 = vector.load %arg2[%c0_29, %c0_30] : memref<8x36xbf16, #tpu.memory_space<vmem>>, vector<8x36xbf16>
    %c0_31 = arith.constant 0 : index
    %c0_32 = arith.constant 0 : index
    %28 = vector.load %arg5[%c0_31, %c0_32] : memref<36x768xbf16, #tpu.memory_space<vmem>>, vector<36x768xbf16>
    %cst = arith.constant dense<0.000000e+00> : vector<8x768xf32>
    %29 = tpu.matmul %27, %28, %cst {dimension_numbers = #tpu.dot_dimension_numbers<[1], [0], [0], [1], [0, 0, 1, 1], [], []>} : vector<8x36xbf16>, vector<36x768xbf16>, vector<8x768xf32> -> vector<8x768xf32>
    %c0_33 = arith.constant 0 : index
    %c0_34 = arith.constant 0 : index
    %30 = vector.load %arg3[%c0_33, %c0_34] : memref<8x1xf32, #tpu.memory_space<vmem>>, vector<8x1xf32>
    %31 = vector.broadcast %30 : vector<8x1xf32> to vector<8x768xf32>
    %32 = arith.addf %29, %31 : vector<8x768xf32>
    %cst_35 = arith.constant 0.000000e+00 : f32
    %33 = vector.broadcast %cst_35 : f32 to vector<8x768xf32>
    %34 = arith.cmpf ogt, %32, %33 : vector<8x768xf32>
    %35 = math.exp %32 : vector<8x768xf32>
    %cst_36 = arith.constant 1.000000e+00 : f32
    %36 = vector.broadcast %cst_36 : f32 to vector<8x768xf32>
    %37 = arith.subf %35, %36 : vector<8x768xf32>
    %38 = arith.select %34, %32, %37 : vector<8x768xi1>, vector<8x768xf32>
    %39 = arith.truncf %38 : vector<8x768xf32> to vector<8x768xbf16>
    %c0_37 = arith.constant 0 : index
    %c0_38 = arith.constant 0 : index
    %40 = vector.load %arg4[%c0_37, %c0_38] : memref<8x768xbf16, #tpu.memory_space<vmem>>, vector<8x768xbf16>
    tpu.vector_store %arg4[%c0_37, %c0_38], %39 {strides = array<i32>} : memref<8x768xbf16, #tpu.memory_space<vmem>>, vector<8x768xbf16>,
    return
  }
  func.func @transform_0(%arg0: i32) -> (i32, i32, i32) {
    %c0_i32 = arith.constant 0 : i32
    %c0_i32_0 = arith.constant 0 : i32
    %c0_i32_1 = arith.constant 0 : i32
    return %arg0, %c0_i32, %c0_i32_0 : i32, i32, i32
  }
  func.func @transform_1(%arg0: i32) -> (i32, i32) {
    %c0_i32 = arith.constant 0 : i32
    %c0_i32_0 = arith.constant 0 : i32
    %c0_i32_1 = arith.constant 0 : i32
    return %c0_i32, %c0_i32_0 : i32, i32
  }
  func.func @transform_2(%arg0: i32) -> (i32, i32) {
    %c0_i32 = arith.constant 0 : i32
    %c0_i32_0 = arith.constant 0 : i32
    %c0_i32_1 = arith.constant 0 : i32
    return %c0_i32, %c0_i32_0 : i32, i32
  }
  func.func @transform_3(%arg0: i32) -> (i32, i32) {
    %c0_i32 = arith.constant 0 : i32
    %c0_i32_0 = arith.constant 0 : i32
    return %c0_i32, %arg0 : i32, i32
  }
}

</mosaic_0001>

<bundles_post_ra>
// kernel: tpu_custom_call.1
= control target key start
LH: loop header
LB: loop body
LE: loop exit
PB: predicated region body
PF: predicated region fallthrough
CT: control target
= control target key end

     0   :  { %8 = vsyncpa [#allocation4], 0  ;;  %s1239_s0 = inlined_call_operand.hbm [shape: bf16[1,4,896], index: 0, kind: input, shape index: {}]   ;;  %s1240_s1 = inlined_call_operand.vmem [shape: bf16[8,36], index: 1, kind: input, shape index: {}]   ;;  %s1241_s2 = inlined_call_operand.vmem [shape: f32[8,1], index: 2, kind: input, shape index: {}]   ;;  %s1242_s3 = inlined_call_operand.hbm [shape: bf16[8,768], index: 3, kind: output, shape index: {}]  }
   0x1   :  { %9 = vsyncpa [#allocation5], 0  ;;  %s994_s12 = smov [#allocation3]   ;;  %s946_s16 = scalar_lea.hbm %s1239_s0, 224 }
   0x2   :  { %s16_s13 = sshll.u32 %s994_s12, 4  ;;  %p947_p0 = scmp.ne.s32.totalorder %s1239_s0, %s946_s16  ;;  %s17_s13 = int_to_ptr.vmem [resolvable:$true] %s16_s13 }
   0x3   :  { %p950_p1 = scmp.lt.u32.totalorder %s946_s16, %s1239_s0 }
   0x5   :  { %p952_p2 = pnand %p950_p1, %p947_p0 }
   0x7   :  { %955 = shalt.err (!%p952_p2)
}
   0x8   :  { %s956_s21 = scalar_lea.vmem %s17_s13, 224  ;;  %p961_p4 = scmp.lt.s32.totalorder %s17_s13, %s17_s13 }
   0x9   :  { %p957_p3 = scmp.ne.s32.totalorder %s17_s13, %s956_s21  ;;  %p962_p5 = scmp.lt.s32.totalorder %s956_s21, %s956_s21 }
   0xb   :  { %p963_p6 = por %p962_p5, %p961_p4 }
   0xd   :  { %p964_p7 = pnand %p963_p6, %p957_p3 }
   0xf   :  { %967 = shalt.err (!%p964_p7)
}
  0x10   :  { %19 = dma.hbm_to_vmem [thread:$0]  %s1239_s0, 224, %s17_s13, [#allocation4]  }
  0x11   :  { %990 = dma.done.wait [#allocation4], 224  }
  0x12   :  { %991 = vsyncadd [#allocation4], 4294967072  ;;  %v68_v0 = vlaneseq  ;;  %v995_v1 = vmov 1983009808   ;;  %v120_v6 = vld [vmem:[#allocation3] sm:$0xff]  ;;  %s996_s24 = smov 126  }
  0x13   :  { %v66_v2 = vunpack.c.l.s4 %v995_v1  ;;  %v124_v8 = vcombine.high %v120_v6, %v120_v6  ;;  %849 = vst.sshfl [vmem:[#allocation2] sm:$0xf pattern:$0x76325410] %v120_v6  ;;  %s997_s25 = smov 127   ;;  %v64_v9 = vcombine.low %v120_v6, %v120_v6  ;;  %s998_s0 = smov 110  }
  0x14   :  { %v69_v3 = vshrl.u32 %v68_v0, 7  ;;  %s999_s26 = smov 109   ;;  %s1000_s27 = smov 108   ;;  %v61_v12 = vld [vmem:[#allocation3 + $0x8] sm:$0x3f]  ;;  %v1004_v28 = vmov 0  }
  0x15   :  { %v67_v4 = vunpack.c.0.s8 %v66_v2  ;;  %850 = vst.sshfl [vmem:[#allocation2 + $0x8] sm:$0xf pattern:$0x76325410] %v124_v8  ;;  %s1001_s28 = smov 92   ;;  %s1002_s29 = smov 91   ;;  %v79_v14 = vcombine.low %v61_v12, %v61_v12  ;;  %685 = vmatprep.mubr.bf16.mxu0 %v1004_v28  ;;  %726 = vmatprep.mubr.bf16.mxu1 %v1004_v28 }
  0x16   :  { %v848_v13 = vld.sshfl [vmem:[#allocation3 + $0x8] sm:$0x33 pattern:$0x76325410]  ;;  %s1003_s30 = smov 90   ;;  %899 = vset.pattern.permute.xlu0 %v1004_v28  ;;  %vm106_vm0 = vcmask 1043456  }
  0x17   :  { %v1038_v5 = vsub.s32 %v67_v4, %v69_v3  ;;  %59 = vst [vmem:[#allocation2 + $0x10] sm:$0x33] %v848_v13  ;;  %v121_v15 = vld [vmem:[#allocation3 + $0x8] sm:$0x3f]  ;;  %vm167_vm1 = vcmask 1031168   ;;  %vm108_vm2 = vcmask 1039360  }
  0x18   :  { %v139_v18 = vcombine.high %v121_v15, %v121_v15  ;;  %v180_v19 = vld [vmem:[#allocation3 + $0x8] sm:$0x3f]  ;;  %vm285_vm3 = vcmask 891904   ;;  %vm226_vm4 = vcmask 900096   ;;  %vm344_vm5 = vcmask 883712  }
  0x19   :  { %v131_v7 = vrot.slane %v120_v6, %v1038_v5  ;;  %v138_v10 = vrot.slane %v124_v8, %v1038_v5  ;;  %v71_v11 = vrot.slane %v64_v9, %v1038_v5  ;;  %v93_v16 = vrot.slane %v61_v12, %v1038_v5  ;;  %v239_v23 = vld [vmem:[#allocation3 + $0x8] sm:$0x3f] }
  0x1a   :  { %v86_v17 = vrot.slane %v79_v14, %v1038_v5  ;;  %v153_v20 = vrot.slane %v139_v18, %v1038_v5  ;;  %v146_v21 = vrot.slane %v121_v15, %v1038_v5  ;;  %v198_v22 = vcombine.low %v180_v19, %v180_v19  ;;  %v298_v27 = vld [vmem:[#allocation3 + $0x8] sm:$0x3f] }
  0x1b   :  { %154 = vrot.lane.b32.xlu1 %v131_v7, %s996_s24  ;;  %96 = vrot.lane.b32.xlu0 %v131_v7, %s997_s25  ;;  %v212_v24 = vrot.slane %v180_v19, %v1038_v5  ;;  %v257_v26 = vcombine.high %v239_v23, %v239_v23  ;;  %v264_v30 = vrot.slane %v239_v23, %v1038_v5  ;;  %v357_v32 = vld [vmem:[#allocation3 + $0x8] sm:$0x3f]  ;;  %vm403_vm6 = vcmask 752640  }
  0x1c   :  { %v205_v25 = vrot.slane %v198_v22, %v1038_v5  ;;  %v316_v31 = vcombine.low %v298_v27, %v298_v27  ;;  %v330_v33 = vrot.slane %v298_v27, %v1038_v5  ;;  %v375_v35 = vcombine.high %v357_v32, %v357_v32  ;;  %v416_v36 = vld [vmem:[#allocation3 + $0x8] sm:$0x3f] }
  0x1d   :  { %v271_v29 = vrot.slane %v257_v26, %v1038_v5  ;;  %v382_v38 = vrot.slane %v357_v32, %v1038_v5  ;;  %v434_v39 = vcombine.low %v416_v36, %v416_v36  ;;  %v475_v40 = vld [vmem:[#allocation3 + $0x8] sm:$0x3f]  ;;  %v448_v41 = vrot.slane %v416_v36, %v1038_v5 }
  0x1e   :  { %v323_v34 = vrot.slane %v316_v31, %v1038_v5  ;;  %v389_v37 = vrot.slane %v375_v35, %v1038_v5  ;;  %v493_v43 = vcombine.high %v475_v40, %v475_v40  ;;  %v500_v45 = vrot.slane %v475_v40, %v1038_v5  ;;  %v549_v46 = vld [vmem:[%s1241_s2] sm:$0xff] }
  0x1f   :  { %215 = vrot.lane.b32.xlu1 %v131_v7, %s998_s0  ;;  %272 = vrot.lane.b32.xlu0 %v131_v7, %s999_s26  ;;  %v441_v42 = vrot.slane %v434_v39, %v1038_v5  ;;  %vm462_vm7 = vcmask 744448   ;;  %vm521_vm8 = vcmask 736256   ;;  %vm634_vm9 = vcmask 1041408  }
  0x20   :  { %v507_v44 = vrot.slane %v493_v43, %v1038_v5  ;;  %vm630_vm10 = vcmask 293888  }
  0x23   :  { %156 = vrot.lane.b32.xlu1 %v138_v10, %s996_s24  ;;  %94 = vrot.lane.b32.xlu0 %v71_v11, %s997_s25 }
  0x27   :  { %274 = vrot.lane.b32.xlu1 %v138_v10, %s999_s26  ;;  %213 = vrot.lane.b32.xlu0 %v71_v11, %s998_s0 }
  0x2b   :  { %333 = vrot.lane.b32.xlu1 %v131_v7, %s1000_s27  ;;  %331 = vrot.lane.b32.xlu0 %v71_v11, %s1000_s27 }
  0x2f   :  { %392 = vrot.lane.b32.xlu1 %v138_v10, %s1001_s28  ;;  %390 = vrot.lane.b32.xlu0 %v131_v7, %s1001_s28 }
  0x33   :  { %451 = vrot.lane.b32.xlu1 %v131_v7, %s1002_s29  ;;  %449 = vrot.lane.b32.xlu0 %v71_v11, %s1002_s29 }
  0x37   :  { %510 = vrot.lane.b32.xlu1 %v138_v10, %s1003_s30  ;;  %508 = vrot.lane.b32.xlu0 %v131_v7, %s1003_s30 }
  0x3b   :  { %100 = vrot.lane.b32.xlu1 %v93_v16, %s997_s25  ;;  %98 = vrot.lane.b32.xlu0 %v86_v17, %s997_s25 }
  0x3f   :  { %160 = vrot.lane.b32.xlu1 %v153_v20, %s996_s24  ;;  %158 = vrot.lane.b32.xlu0 %v146_v21, %s996_s24 }
  0x43   :  { %219 = vrot.lane.b32.xlu1 %v212_v24, %s998_s0  ;;  %217 = vrot.lane.b32.xlu0 %v205_v25, %s998_s0 }
  0x47   :  { %278 = vrot.lane.b32.xlu1 %v271_v29, %s999_s26  ;;  %276 = vrot.lane.b32.xlu0 %v264_v30, %s999_s26 }
  0x4b   :  { %337 = vrot.lane.b32.xlu1 %v330_v33, %s1000_s27  ;;  %335 = vrot.lane.b32.xlu0 %v323_v34, %s1000_s27 }
  0x4f   :  { %396 = vrot.lane.b32.xlu1 %v389_v37, %s1001_s28  ;;  %394 = vrot.lane.b32.xlu0 %v382_v38, %s1001_s28 }
  0x53   :  { %455 = vrot.lane.b32.xlu1 %v448_v41, %s1002_s29  ;;  %453 = vrot.lane.b32.xlu0 %v441_v42, %s1002_s29 }
  0x57   :  { %514 = vrot.lane.b32.xlu1 %v507_v44, %s1003_s30  ;;  %512 = vrot.lane.b32.xlu0 %v500_v45, %s1003_s30 }
  0x5b   :  { %552 = vperm.xlu0 %899, %v549_v46  }
  0x8d   :  { %v155_v47 = vpop.permute.xlu1 %154  ;;  %v1097_v48 = vpop.permute.xlu0 %96 }
  0x8e   :  { %v162_v53 = vrot.slane %v155_v47, 4  ;;  %v103_v54 = vrot.slane %v1097_v48, 4 }
  0x91   :  { %v1099_v49 = vpop.permute.xlu1 %215  ;;  %v273_v50 = vpop.permute.xlu0 %272 }
  0x92   :  { %v222_v63 = vrot.slane %v1099_v49, 4  ;;  %v280_v0 = vrot.slane %v273_v50, 4 }
  0x95   :  { %v1101_v51 = vpop.permute.xlu1 %156  ;;  %v95_v52 = vpop.permute.xlu0 %94 }
  0x96   :  { %v163_v55 = vrot.slane %v1101_v51, 4  ;;  %v102_v56 = vrot.slane %v95_v52, 4 }
  0x98   :  { %v166_v57 = vsel %vm106_vm0, %v162_v53, %v163_v55  ;;  %v107_v58 = vsel %vm106_vm0, %v102_v56, %v103_v54 }
  0x99   :  { %v168_v59 = vsel %vm167_vm1, %v155_v47, %v166_v57  ;;  %v109_v60 = vsel %vm108_vm2, %v95_v52, %v107_v58  ;;  %v1113_v61 = vpop.permute.xlu1 %274  ;;  %v214_v62 = vpop.permute.xlu0 %213 }
  0x9a   :  { %176 = vst [vmem:[#allocation2 + $0x18] sm:$0x33] %v168_v59  ;;  %117 = vst [vmem:[#allocation2] sm:$0xcc] %v109_v60  ;;  %v281_v1 = vrot.slane %v1113_v61, 4  ;;  %v221_v2 = vrot.slane %v214_v62, 4 }
  0x9c   :  { %v284_v3 = vsel %vm106_vm0, %v280_v0, %v281_v1  ;;  %v225_v4 = vsel %vm106_vm0, %v221_v2, %v222_v63 }
  0x9d   :  { %v286_v5 = vsel %vm285_vm3, %v273_v50, %v284_v3  ;;  %v227_v6 = vsel %vm226_vm4, %v214_v62, %v225_v4  ;;  %v1125_v7 = vpop.permute.xlu1 %333  ;;  %v332_v8 = vpop.permute.xlu0 %331 }
  0x9e   :  { %294 = vst [vmem:[#allocation2 + $0x30] sm:$0x33] %v286_v5  ;;  %235 = vst [vmem:[#allocation2 + $0x18] sm:$0xcc] %v227_v6  ;;  %v340_v9 = vrot.slane %v1125_v7, 4  ;;  %v339_v10 = vrot.slane %v332_v8, 4 }
  0x9f   :  { %v1179_v6 = vld [vmem:[%s1240_s1] sm:$0xf]  ;;  %s1005_s1 = smov [#allocation6]  }
  0xa0   :  { %v343_v11 = vsel %vm106_vm0, %v339_v10, %v340_v9  ;;  %s839_s7 = sshll.u32 %s1005_s1, 4  ;;  %s840_s7 = int_to_ptr.vmem [resolvable:$true] %s839_s7 }
  0xa1   :  { %v345_v12 = vsel %vm344_vm5, %v332_v8, %v343_v11  ;;  %v1132_v13 = vpop.permute.xlu1 %392  ;;  %v391_v14 = vpop.permute.xlu0 %390  ;;  %s968_s8 = scalar_lea.vmem %s840_s7, 384  ;;  %p973_p9 = scmp.lt.s32.totalorder %s840_s7, %s840_s7 }
  0xa2   :  { %353 = vst [vmem:[#allocation2 + $0x30] sm:$0xcc] %v345_v12  ;;  %v399_v15 = vrot.slane %v1132_v13, 4  ;;  %v398_v16 = vrot.slane %v391_v14, 4  ;;  %p969_p8 = scmp.ne.s32.totalorder %s840_s7, %s968_s8  ;;  %p974_p10 = scmp.lt.s32.totalorder %s968_s8, %s968_s8 }
  0xa4   :  { %v402_v17 = vsel %vm106_vm0, %v398_v16, %v399_v15  ;;  %p975_p11 = por %p974_p10, %p973_p9 }
  0xa5   :  { %v404_v18 = vsel %vm403_vm6, %v391_v14, %v402_v17  ;;  %v1139_v19 = vpop.permute.xlu1 %451  ;;  %v450_v20 = vpop.permute.xlu0 %449  ;;  %v910_v21 = vld [vmem:[#allocation2 + $0x4] ss:$24 sps:$4 sm:$0xff]   ;;  %v912_v22 = vld [vmem:[#allocation2] ss:$24 sps:$4 sm:$0xff]  }
  0xa6   :  { %412 = vst [vmem:[#allocation2 + $0x48] sm:$0x33] %v404_v18  ;;  %v458_v23 = vrot.slane %v1139_v19, 4  ;;  %v457_v24 = vrot.slane %v450_v20, 4  ;;  %653 = vmatprep.subr.bf16.mxu0 %v910_v21  ;;  %p976_p12 = pnand %p975_p11, %p969_p8 }
  0xa7   :  { %654 = vmatpush1.bf16.msra.mxu0 %v912_v22 }
  0xa8   :  { %v461_v25 = vsel %vm106_vm0, %v457_v24, %v458_v23 }
  0xa9   :  { %v463_v26 = vsel %vm462_vm7, %v450_v20, %v461_v25  ;;  %v1146_v27 = vpop.permute.xlu1 %510  ;;  %v509_v29 = vpop.permute.xlu0 %508 }
  0xaa   :  { %471 = vst [vmem:[#allocation2 + $0x48] sm:$0xcc] %v463_v26  ;;  %v517_v30 = vrot.slane %v1146_v27, 4  ;;  %v516_v31 = vrot.slane %v509_v29, 4 }
  0xac   :  { %v520_v32 = vsel %vm106_vm0, %v516_v31, %v517_v30 }
  0xad   :  { %v522_v33 = vsel %vm521_vm8, %v509_v29, %v520_v32  ;;  %v101_v34 = vpop.permute.xlu1 %100  ;;  %v99_v35 = vpop.permute.xlu0 %98 }
  0xae   :  { %530 = vst [vmem:[#allocation2 + $0x60] sm:$0x33] %v522_v33  ;;  %v105_v36 = vrot.slane %v101_v34, 4  ;;  %v104_v37 = vrot.slane %v99_v35, 4 }
  0xb0   :  { %v110_v38 = vsel %vm106_vm0, %v103_v54, %v104_v37  ;;  %v112_v39 = vsel %vm106_vm0, %v104_v37, %v105_v36 }
  0xb1   :  { %v111_v40 = vsel %vm108_vm2, %v1097_v48, %v110_v38  ;;  %v113_v41 = vsel %vm108_vm2, %v99_v35, %v112_v39  ;;  %v161_v42 = vpop.permute.xlu1 %160  ;;  %v159_v43 = vpop.permute.xlu0 %158  ;;  %v913_v44 = vld [vmem:[#allocation2 + $0x34] ss:$24 sps:$4 sm:$0xff]   ;;  %v915_v45 = vld [vmem:[#allocation2 + $0x30] ss:$24 sps:$4 sm:$0xff]  }
  0xb2   :  { %118 = vst [vmem:[#allocation2 + $0x8] sm:$0xcc] %v111_v40  ;;  %119 = vst [vmem:[#allocation2 + $0x10] sm:$0xcc] %v113_v41  ;;  %v165_v46 = vrot.slane %v161_v42, 4  ;;  %v164_v47 = vrot.slane %v159_v43, 4  ;;  %655 = vmatprep.subr.bf16.mxu0 %v913_v44 }
  0xb3   :  { %656 = vmatpush1.bf16.msra.mxu0 %v915_v45 }
  0xb4   :  { %v169_v50 = vsel %vm106_vm0, %v163_v55, %v164_v47  ;;  %v171_v52 = vsel %vm106_vm0, %v164_v47, %v165_v46 }
  0xb5   :  { %v170_v48 = vsel %vm167_vm1, %v1101_v51, %v169_v50  ;;  %v172_v53 = vsel %vm167_vm1, %v159_v43, %v171_v52  ;;  %v220_v54 = vpop.permute.xlu1 %219  ;;  %v218_v56 = vpop.permute.xlu0 %217  ;;  %v546_v57 = vld [vmem:[#allocation2 + $0x60] sm:$0x33] }
  0xb6   :  { %177 = vst [vmem:[#allocation2 + $0x20] sm:$0x33] %v170_v48  ;;  %178 = vst [vmem:[#allocation2 + $0x28] sm:$0x33] %v172_v53  ;;  %v224_v58 = vrot.slane %v220_v54, 4  ;;  %v223_v59 = vrot.slane %v218_v56, 4  ;;  %v864_v60 = vcombine.high %v546_v57, %v546_v57  ;;  %v863_v62 = vcombine.low %v546_v57, %v546_v57 }
  0xb8   :  { %v228_v55 = vsel %vm106_vm0, %v222_v63, %v223_v59  ;;  %v230_v0 = vsel %vm106_vm0, %v223_v59, %v224_v58  ;;  %869 = vmatprep.subr.msk.bf16.mxu0 %vm634_vm9, %v864_v60  ;;  %v636_v51 = vsel %vm634_vm9, %v863_v62, 0 }
  0xb9   :  { %v229_v2 = vsel %vm226_vm4, %v1099_v49, %v228_v55  ;;  %v231_v3 = vsel %vm226_vm4, %v218_v56, %v230_v0  ;;  %v279_v4 = vpop.permute.xlu1 %278  ;;  %v277_v5 = vpop.permute.xlu0 %276  ;;  %658 = vmatpush1.bf16.msra.mxu0 %v636_v51 }
  0xba   :  { %236 = vst [vmem:[#allocation2 + $0x20] sm:$0xcc] %v229_v2  ;;  %237 = vst [vmem:[#allocation2 + $0x28] sm:$0xcc] %v231_v3  ;;  %v283_v63 = vrot.slane %v279_v4, 4  ;;  %v282_v8 = vrot.slane %v277_v5, 4 }
  0xbc   :  { %v287_v10 = vsel %vm106_vm0, %v281_v1, %v282_v8  ;;  %v289_v49 = vsel %vm106_vm0, %v282_v8, %v283_v63  ;;  %870 = vmatmul.mubr.msk.bf16.vlgmr.msra.gmra.mrb[0].mxu0 %vm630_vm10, %v1179_v6 }
  0xbd   :  { %v288_v11 = vsel %vm285_vm3, %v1113_v61, %v287_v10  ;;  %v290_v12 = vsel %vm285_vm3, %v277_v5, %v289_v49  ;;  %v338_v14 = vpop.permute.xlu1 %337  ;;  %v336_v16 = vpop.permute.xlu0 %335  ;;  %767 = vmatprep.mubr.bf16.mxu0 %v1004_v28 }
  0xbe   :  { %295 = vst [vmem:[#allocation2 + $0x38] sm:$0x33] %v288_v11  ;;  %296 = vst [vmem:[#allocation2 + $0x40] sm:$0x33] %v290_v12  ;;  %v342_v17 = vrot.slane %v338_v14, 4  ;;  %v341_v18 = vrot.slane %v336_v16, 4 }
  0xc0   :  { %v346_v1 = vsel %vm106_vm0, %v340_v9, %v341_v18  ;;  %v348_v20 = vsel %vm106_vm0, %v341_v18, %v342_v17 }
  0xc1   :  { %v347_v21 = vsel %vm344_vm5, %v1125_v7, %v346_v1  ;;  %v349_v61 = vsel %vm344_vm5, %v336_v16, %v348_v20  ;;  %v397_v22 = vpop.permute.xlu1 %396  ;;  %v395_v24 = vpop.permute.xlu0 %394  ;;  %v918_v25 = vld [vmem:[#allocation2 + $0xc] ss:$24 sps:$4 sm:$0xff]   ;;  %v920_v29 = vld [vmem:[#allocation2 + $0x10] ss:$24 sps:$4 sm:$0xff]  }
  0xc2   :  { %354 = vst [vmem:[#allocation2 + $0x38] sm:$0xcc] %v347_v21  ;;  %355 = vst [vmem:[#allocation2 + $0x40] sm:$0xcc] %v349_v61  ;;  %v401_v28 = vrot.slane %v397_v22, 4  ;;  %v400_v26 = vrot.slane %v395_v24, 4  ;;  %694 = vmatprep.subr.bf16.mxu1 %v918_v25 }
  0xc3   :  { %v922_v31 = vld [vmem:[#allocation2 + $0x14] ss:$24 sps:$4 sm:$0xff]   ;;  %v923_v32 = vld [vmem:[#allocation2 + $0x8] ss:$24 sps:$4 sm:$0xff]  }
  0xc4   :  { %v405_v9 = vsel %vm106_vm0, %v399_v15, %v400_v26  ;;  %v407_v33 = vsel %vm106_vm0, %v400_v26, %v401_v28  ;;  %735 = vmatprep.subr.bf16.mxu0 %v922_v31  ;;  %695 = vmatpush1.bf16.msra.mxu1 %v923_v32 }
  0xc5   :  { %v406_v7 = vsel %vm403_vm6, %v1132_v13, %v405_v9  ;;  %v408_v34 = vsel %vm403_vm6, %v395_v24, %v407_v33  ;;  %v456_v35 = vpop.permute.xlu1 %455  ;;  %v454_v36 = vpop.permute.xlu0 %453  ;;  %736 = vmatpush1.bf16.msra.mxu0 %v920_v29 }
  0xc6   :  { %413 = vst [vmem:[#allocation2 + $0x50] sm:$0x33] %v406_v7  ;;  %414 = vst [vmem:[#allocation2 + $0x58] sm:$0x33] %v408_v34  ;;  %v460_v37 = vrot.slane %v456_v35, 4  ;;  %v459_v38 = vrot.slane %v454_v36, 4 }
  0xc8   :  { %v464_v15 = vsel %vm106_vm0, %v458_v23, %v459_v38  ;;  %v466_v39 = vsel %vm106_vm0, %v459_v38, %v460_v37 }
  0xc9   :  { %v465_v40 = vsel %vm462_vm7, %v1139_v19, %v464_v15  ;;  %v467_v13 = vsel %vm462_vm7, %v454_v36, %v466_v39  ;;  %v515_v41 = vpop.permute.xlu1 %514  ;;  %v513_v42 = vpop.permute.xlu0 %512 }
  0xca   :  { %472 = vst [vmem:[#allocation2 + $0x50] sm:$0xcc] %v465_v40  ;;  %473 = vst [vmem:[#allocation2 + $0x58] sm:$0xcc] %v467_v13  ;;  %v519_v43 = vrot.slane %v515_v41, 4  ;;  %v518_v44 = vrot.slane %v513_v42, 4 }
  0xcc   :  { %v523_v45 = vsel %vm106_vm0, %v517_v30, %v518_v44  ;;  %v525_v46 = vsel %vm106_vm0, %v518_v44, %v519_v43 }
  0xcd   :  { %v524_v23 = vsel %vm521_vm8, %v1146_v27, %v523_v45  ;;  %v526_v47 = vsel %vm521_vm8, %v513_v42, %v525_v46 }
  0xce   :  { %531 = vst [vmem:[#allocation2 + $0x68] sm:$0x33] %v524_v23  ;;  %532 = vst [vmem:[#allocation2 + $0x70] sm:$0x33] %v526_v47 }
  0xd1   :  { %v924_v19 = vld [vmem:[#allocation2 + $0x3c] ss:$24 sps:$4 sm:$0xff]   ;;  %v926_v50 = vld [vmem:[#allocation2 + $0x40] ss:$24 sps:$4 sm:$0xff]  }
  0xd2   :  { %v928_v52 = vld [vmem:[#allocation2 + $0x44] ss:$24 sps:$4 sm:$0xff]   ;;  %v929_v48 = vld [vmem:[#allocation2 + $0x38] ss:$24 sps:$4 sm:$0xff]   ;;  %696 = vmatprep.subr.bf16.mxu1 %v924_v19 }
  0xd3   :  { %737 = vmatprep.subr.bf16.mxu0 %v928_v52  ;;  %697 = vmatpush1.bf16.msra.mxu1 %v929_v48 }
  0xd4   :  { %738 = vmatpush1.bf16.msra.mxu0 %v926_v50 }
  0xd5   :  { %v547_v53 = vld [vmem:[#allocation2 + $0x68] sm:$0x33]  ;;  %v548_v54 = vld [vmem:[#allocation2 + $0x70] sm:$0x33] }
  0xd6   :  { %v866_v30 = vcombine.high %v547_v53, %v547_v53  ;;  %v868_v56 = vcombine.high %v548_v54, %v548_v54  ;;  %v865_v57 = vcombine.low %v547_v53, %v547_v53  ;;  %v867_v58 = vcombine.low %v548_v54, %v548_v54 }
  0xd8   :  { %871 = vmatprep.subr.msk.bf16.mxu1 %vm634_vm9, %v866_v30  ;;  %873 = vmatprep.subr.msk.bf16.mxu0 %vm634_vm9, %v868_v56  ;;  %v642_v27 = vsel %vm634_vm9, %v865_v57, 0  ;;  %v648_v59 = vsel %vm634_vm9, %v867_v58, 0 }
  0xd9   :  { %699 = vmatpush1.bf16.msra.mxu1 %v642_v27  ;;  %740 = vmatpush1.bf16.msra.mxu0 %v648_v59 }
  0xda   :  { %v553_v60 = vpop.permute.xlu0 %552 }
  0xdc   :  { %872 = vmatmul.mubr.msk.bf16.vlgmr.msra.gmra.mrb[0].mxu1 %vm630_vm10, %v1179_v6  ;;  %874 = vmatmul.mubr.msk.bf16.vlgmr.msra.gmra.mrb[4].mxu0 %vm630_vm10, %v1179_v6 }
 0x18f   :  { %v687_v62 = vpop.f32.mrb[0].mxu0 }
 0x190   :  { %v688_v55 = vadd.f32 %v687_v62, %v553_v60  ;;  %v689_v0 = vpop.f32.mrb[1].mxu0 }
 0x191   :  { %v690_v51 = vadd.f32 %v689_v0, %v553_v60  ;;  %v691_v2 = vpop.f32.mrb[2].mxu0 }
 0x192   :  { %v782_v3 = vmul.f32 1.442695, %v688_v55  ;;  %v692_v4 = vpop.f32.mrb[3].mxu0  ;;  %vm776_vm11 = vcmp.gt.f32.partialorder %v688_v55, 0.0 }
 0x193   :  { %v784_v5 = vmul.f32 1.442695, %v690_v51  ;;  %vm777_vm12 = vcmp.gt.f32.partialorder %v690_v51, 0.0 }
 0x194   :  { %934 = vpow2.f32 %v782_v3 }
 0x195   :  { %936 = vpow2.f32 %v784_v5 }
 0x19e   :  { %v935_v63 = vpop.eup %934 }
 0x19f   :  { %v937_v8 = vpop.eup %936  ;;  %v875_v10 = vadd.f32 -1.0, %v935_v63 }
 0x1a0   :  { %v876_v49 = vadd.f32 -1.0, %v937_v8 }
 0x1a1   :  { %v800_v11 = vsel %vm776_vm11, %v688_v55, %v875_v10 }
 0x1a2   :  { %v801_v12 = vsel %vm777_vm12, %v690_v51, %v876_v49 }
 0x1a3   :  { %v884_v6 = vpack.c.bf16 %v801_v12, %v800_v11 }
 0x1a5   :  { %830 = vst [vmem:[#allocation6] sm:$0xff] %v884_v6 }
 0x1af   :  { %v728_v14 = vpop.f32.mrb[0].mxu1  ;;  %v769_v16 = vpop.f32.mrb[4].mxu0 }
 0x1b0   :  { %v729_v17 = vadd.f32 %v728_v14, %v553_v60  ;;  %v770_v18 = vadd.f32 %v769_v16, %v553_v60  ;;  %v730_v1 = vpop.f32.mrb[1].mxu1  ;;  %v771_v20 = vpop.f32.mrb[5].mxu0 }
 0x1b1   :  { %v731_v21 = vadd.f32 %v730_v1, %v553_v60  ;;  %v772_v61 = vadd.f32 %v771_v20, %v553_v60  ;;  %v732_v22 = vpop.f32.mrb[2].mxu1  ;;  %v773_v24 = vpop.f32.mrb[6].mxu0 }
 0x1b2   :  { %v786_v25 = vmul.f32 1.442695, %v729_v17  ;;  %v790_v28 = vmul.f32 1.442695, %v770_v18  ;;  %v733_v31 = vpop.f32.mrb[3].mxu1  ;;  %v774_v32 = vpop.f32.mrb[7].mxu0 }
 0x1b3   :  { %v788_v26 = vmul.f32 1.442695, %v731_v21  ;;  %v792_v29 = vmul.f32 1.442695, %v772_v61  ;;  %vm778_vm13 = vcmp.gt.f32.partialorder %v729_v17, 0.0  ;;  %vm780_vm14 = vcmp.gt.f32.partialorder %v770_v18, 0.0 }
 0x1b4   :  { %938 = vpow2.f32 %v786_v25  ;;  %vm779_vm15 = vcmp.gt.f32.partialorder %v731_v21, 0.0  ;;  %vm781_vm0 = vcmp.gt.f32.partialorder %v772_v61, 0.0 }
 0x1b5   :  { %940 = vpow2.f32 %v790_v28 }
 0x1b6   :  { %942 = vpow2.f32 %v788_v26 }
 0x1b7   :  { %944 = vpow2.f32 %v792_v29 }
 0x1be   :  { %v939_v9 = vpop.eup %938 }
 0x1bf   :  { %v941_v33 = vpop.eup %940  ;;  %v877_v7 = vadd.f32 -1.0, %v939_v9 }
 0x1c0   :  { %v943_v34 = vpop.eup %942  ;;  %v879_v35 = vadd.f32 -1.0, %v941_v33 }
 0x1c1   :  { %v945_v36 = vpop.eup %944  ;;  %v802_v37 = vsel %vm778_vm13, %v729_v17, %v877_v7  ;;  %v878_v38 = vadd.f32 -1.0, %v943_v34 }
 0x1c2   :  { %v804_v15 = vsel %vm780_vm14, %v770_v18, %v879_v35  ;;  %v880_v39 = vadd.f32 -1.0, %v945_v36 }
 0x1c3   :  { %v803_v40 = vsel %vm779_vm15, %v731_v21, %v878_v38 }
 0x1c4   :  { %v885_v13 = vpack.c.bf16 %v803_v40, %v802_v37  ;;  %v805_v41 = vsel %vm781_vm0, %v772_v61, %v880_v39 }
 0x1c5   :  { %v886_v42 = vpack.c.bf16 %v805_v41, %v804_v15 }
 0x1c6   :  { %831 = vst [vmem:[#allocation6 + $0x8] sm:$0xff] %v885_v13 }
 0x1c7   :  { %832 = vst [vmem:[#allocation6 + $0x10] sm:$0xff] %v886_v42 }
 0x1c8   :  { %979 = shalt.err (!%p976_p12)
}
 0x1c9   :  { %s980_s11 = scalar_lea.hbm %s1242_s3, 384 }
 0x1ca   :  { %p981_p13 = scmp.ne.s32.totalorder %s1242_s3, %s980_s11  ;;  %p984_p0 = scmp.lt.u32.totalorder %s980_s11, %s1242_s3 }
 0x1cc   :  { %p986_p1 = pnand %p984_p0, %p981_p13 }
 0x1ce   :  { %989 = shalt.err (!%p986_p1)
}
 0x1cf   :  { %842 = dma.vmem_to_hbm [thread:$0]  %s840_s7, 384, %s1242_s3, [#allocation5]  }
 0x1d0   :  { %992 = dma.done.wait [#allocation5], 384  }
 0x1d1   :  { %993 = vsyncadd [#allocation5], 4294966912 }
 0x1d2   :  { %846 = vsyncpa [#allocation4], 1 }
 0x1d3   :  { %847 = vsyncpa [#allocation5], 1 }

</bundles_post_ra>
